<compile_context>
chip_gen: v7x
topology: tpu7x:2x2x1
jax: 0.10.0
libtpu: 0.0.40
codegen_flags: <defaults>
</compile_context>

<pallas_src>
import jax
import jax.numpy as jnp
from jax import lax
from jax.experimental import pallas as pl
from jax.experimental.pallas import tpu as pltpu


def _round_up(x, m):
    return ((x + m - 1) // m) * m


# ------------------------------------------------------------------ embedding
def _emb_kernel(ids_ref, table_ref, out_ref):
    ids = ids_ref[...]                                       # (N, 1) int32
    n = ids.shape[0]
    v = table_ref.shape[0]
    iota = lax.broadcasted_iota(jnp.int32, (n, v), 1)
    onehot = (iota == ids).astype(jnp.float32)               # (N, V)
    out_ref[...] = jnp.dot(onehot, table_ref[...],
                           preferred_element_type=jnp.float32)


def embedding_lookup(table, ids_col):
    """out[i] = table[ids_col[i, 0]] — single kernel invocation, table
    resident in VMEM, gather as a one-hot MXU matmul."""
    n = ids_col.shape[0]
    e = table.shape[1]
    return pl.pallas_call(
        _emb_kernel,
        out_shape=jax.ShapeDtypeStruct((n, e), jnp.float32),
    )(ids_col, table)


# --------------------------------------------- fused bidirectional LSTM layer
def _lstm_layer_kernel(x_ref, wihf_ref, wihr_ref, whhf_ref, whhr_ref,
                       bf_ref, br_ref, h0f_ref, c0f_ref, h0r_ref, c0r_ref,
                       out_ref, hnf_ref, cnf_ref, hnr_ref, cnr_ref,
                       outf_s, outr_s):
    t_len = x_ref.shape[0]
    h = whhf_ref.shape[0]

    def cell(x_t, h_prev, c_prev, wih_ref, whh_ref, b_ref):
        # gates = x_t @ W_ih^T + h_{t-1} @ W_hh^T + (b_ih + b_hh)   -> (Bp, 4H)
        gates = (jnp.dot(x_t, wih_ref[...], preferred_element_type=jnp.float32)
                 + jnp.dot(h_prev, whh_ref[...],
                           preferred_element_type=jnp.float32)
                 + b_ref[...])
        i_g = jax.nn.sigmoid(gates[:, 0 * h:1 * h])
        f_g = jax.nn.sigmoid(gates[:, 1 * h:2 * h])
        g_g = jnp.tanh(gates[:, 2 * h:3 * h])
        o_g = jax.nn.sigmoid(gates[:, 3 * h:4 * h])
        c_new = f_g * c_prev + i_g * g_g
        h_new = o_g * jnp.tanh(c_new)
        return h_new, c_new

    def body(s, carry):
        h_f, c_f, h_r, c_r = carry
        rt = t_len - 1 - s
        h_f, c_f = cell(x_ref[s], h_f, c_f, wihf_ref, whhf_ref, bf_ref)
        h_r, c_r = cell(x_ref[rt], h_r, c_r, wihr_ref, whhr_ref, br_ref)
        outf_s[s] = h_f
        outr_s[rt] = h_r
        return h_f, c_f, h_r, c_r

    # TODO(synk): on v7x the two directions could be sharded across the two
    # TensorCores (leading "parallel" grid axis of size 2); single-body here.
    h_f, c_f, h_r, c_r = lax.fori_loop(
        0, t_len, body,
        (h0f_ref[...], c0f_ref[...], h0r_ref[...], c0r_ref[...]),
        unroll=(t_len <= 32))

    hnf_ref[...] = h_f
    cnf_ref[...] = c_f
    hnr_ref[...] = h_r
    cnr_ref[...] = c_r
    # packed (T, Bp, 2H) output: [fwd | rev] on the lane axis
    out_ref[:, :, 0:h] = outf_s[...]
    out_ref[:, :, h:2 * h] = outr_s[...]


def lstm_layer_bidir(x, wihf_t, wihr_t, whhf_t, whhr_t, bf, br,
                     h0f, c0f, h0r, c0r):
    """x: (T, Bp, I) time-major. W_*^T transposed for (row) @ (I|H, 4H) dots.
    Returns packed (T, Bp, 2H) output plus h_n / c_n per direction."""
    t_len, bp, in_dim = x.shape
    h = whhf_t.shape[0]
    g = 4 * h
    f32 = jnp.float32
    m2 = lambda i: (0, 0)
    m3 = lambda i: (0, 0, 0)
    return pl.pallas_call(
        _lstm_layer_kernel,
        grid=(1,),
        in_specs=[
            pl.BlockSpec((t_len, bp, in_dim), m3),   # x (whole sequence)
            pl.BlockSpec((in_dim, g), m2),           # W_ih^T fwd
            pl.BlockSpec((in_dim, g), m2),           # W_ih^T rev
            pl.BlockSpec((h, g), m2),                # W_hh^T fwd
            pl.BlockSpec((h, g), m2),                # W_hh^T rev
            pl.BlockSpec((1, g), m2),                # b_ih+b_hh fwd
            pl.BlockSpec((1, g), m2),                # b_ih+b_hh rev
            pl.BlockSpec((bp, h), m2),               # h0 fwd
            pl.BlockSpec((bp, h), m2),               # c0 fwd
            pl.BlockSpec((bp, h), m2),               # h0 rev
            pl.BlockSpec((bp, h), m2),               # c0 rev
        ],
        out_specs=[
            pl.BlockSpec((t_len, bp, 2 * h), m3),    # packed output
            pl.BlockSpec((bp, h), m2),               # h_n fwd
            pl.BlockSpec((bp, h), m2),               # c_n fwd
            pl.BlockSpec((bp, h), m2),               # h_n rev
            pl.BlockSpec((bp, h), m2),               # c_n rev
        ],
        out_shape=[
            jax.ShapeDtypeStruct((t_len, bp, 2 * h), f32),
            jax.ShapeDtypeStruct((bp, h), f32),
            jax.ShapeDtypeStruct((bp, h), f32),
            jax.ShapeDtypeStruct((bp, h), f32),
            jax.ShapeDtypeStruct((bp, h), f32),
        ],
        scratch_shapes=[pltpu.VMEM((t_len, bp, h), f32),
                        pltpu.VMEM((t_len, bp, h), f32)],
        compiler_params=pltpu.CompilerParams(
            dimension_semantics=("arbitrary",)),
    )(x, wihf_t, wihr_t, whhf_t, whhr_t, bf, br, h0f, c0f, h0r, c0r)


# --------------------------------------------------------------- sampling head
def _sampling_kernel(x_ref, w_ref, eps_ref, packed_ref, samp_ref):
    proj = jnp.dot(x_ref[...], w_ref[...],
                   preferred_element_type=jnp.float32)        # (tm, 4H) = [mu|logvar]
    n = proj.shape[1]
    d = n // 2
    lane = lax.broadcasted_iota(jnp.int32, proj.shape, 1)
    is_mu = lane < d
    lo = jnp.where(is_mu, -100.0, -10.0)
    hi = jnp.where(is_mu, 100.0, 10.0)
    packed = jnp.clip(proj, lo, hi)                           # lane-wise clamp
    packed_ref[...] = packed                                  # one 128-lane dense store
    mu = packed[:, :d]
    logvar = packed[:, d:]
    samp_ref[...] = mu + eps_ref[...] * jnp.exp(0.5 * logvar)


def sampling_head(x2d, w_cat, eps2d, tm=512):
    """x2d: (M, 2H); w_cat: (2H, 4H) = [mu_est | sigma_est]; eps2d: (M, 2H)."""
    m, d2 = x2d.shape
    n = w_cat.shape[1]
    d = n // 2
    tm = min(tm, _round_up(m, 8))
    mp = _round_up(m, tm)
    if mp != m:
        x2d = jnp.pad(x2d, ((0, mp - m), (0, 0)))
        eps2d = jnp.pad(eps2d, ((0, mp - m), (0, 0)))
    packed, samp = pl.pallas_call(
        _sampling_kernel,
        out_shape=[jax.ShapeDtypeStruct((mp, n), jnp.float32),
                   jax.ShapeDtypeStruct((mp, d), jnp.float32)],
        grid=(mp // tm,),
        in_specs=[
            pl.BlockSpec((tm, d2), lambda i: (i, 0)),
            pl.BlockSpec((d2, n), lambda i: (0, 0)),
            pl.BlockSpec((tm, d), lambda i: (i, 0)),
        ],
        out_specs=[pl.BlockSpec((tm, n), lambda i: (i, 0)),
                   pl.BlockSpec((tm, d), lambda i: (i, 0))],
        compiler_params=pltpu.CompilerParams(
            dimension_semantics=("parallel",)),
    )(x2d, w_cat, eps2d)
    return samp[:m], packed[:m, :d], packed[:m, d:]


# ------------------------------------------------------------------- forward
def eecoder_gen_lstm_forward(word_input, last_hidden, params, eps):
    """Pallas forward of Eecoder_Gen_lstm (sampling=True, eval-mode dropout).

    word_input:  (B, T) int32 token ids
    last_hidden: (h0, c0), each (2*n_layers, B, H)  [fwd/rev interleaved, PyTorch layout]
    eps:         (B, T, 2H) standard-normal noise (torch.randn_like equivalent)
    """
    h0, c0 = last_hidden
    b, t = word_input.shape
    table = params["embedding"]
    v, e = table.shape
    n_layers = len(params["lstm"])
    hdim = params["lstm"][0]["fwd"][1].shape[1]          # w_hh: (4H, H)

    # Pad the batch dim once to the 8-sublane width; slice back at the very end.
    bp = _round_up(max(b, 8), 8)

    # Time-major, batch-padded ids -> single-shot on-chip embedding gather.
    ids_tm = jnp.pad(word_input.T.astype(jnp.int32), ((0, 0), (0, bp - b)))
    vpad = _round_up(v, 128)
    table_p = jnp.pad(table, ((0, vpad - v), (0, 0)))
    emb = embedding_lookup(table_p, ids_tm.reshape(t * bp, 1))
    x = emb.reshape(t, bp, e)                            # (T, Bp, E)

    h0p = jnp.pad(h0, ((0, 0), (0, bp - b), (0, 0)))
    c0p = jnp.pad(c0, ((0, 0), (0, bp - b), (0, 0)))

    hns, cns = [], []
    for layer in range(n_layers):
        w_ih_f, w_hh_f, b_ih_f, b_hh_f = params["lstm"][layer]["fwd"]
        w_ih_r, w_hh_r, b_ih_r, b_hh_r = params["lstm"][layer]["rev"]
        x, hnf, cnf, hnr, cnr = lstm_layer_bidir(
            x,
            w_ih_f.T, w_ih_r.T, w_hh_f.T, w_hh_r.T,
            (b_ih_f + b_hh_f).reshape(1, -1),
            (b_ih_r + b_hh_r).reshape(1, -1),
            h0p[2 * layer], c0p[2 * layer],
            h0p[2 * layer + 1], c0p[2 * layer + 1])
        # TODO(synk): nn.LSTM inter-layer dropout (p=0.3) is a training-only op; eval mode assumed.
        hns += [hnf, hnr]
        cns += [cnf, cnr]

    # Sampling head: one lane-dense (2H, 4H) matmul, packed mu|logvar output.
    rnn2d = x.reshape(t * bp, 2 * hdim)
    eps_tm = jnp.pad(eps.transpose(1, 0, 2), ((0, 0), (0, bp - b), (0, 0)))
    eps2d = eps_tm.reshape(t * bp, 2 * hdim)
    w_cat = jnp.concatenate([params["mu_est"], params["sigma_est"]], axis=1)
    samp2d, mu2d, logvar2d = sampling_head(rnn2d, w_cat, eps2d)

    def to_btd(a2d):
        return a2d.reshape(t, bp, 2 * hdim)[:, :b].transpose(1, 0, 2)

    rnn_output = to_btd(samp2d)
    mu = to_btd(mu2d)
    logvar = to_btd(logvar2d)
    h_n = jnp.stack(hns, axis=0)[:, :b]
    c_n = jnp.stack(cns, axis=0)[:, :b]
    return rnn_output, (h_n, c_n), mu, logvar


# ---------------------------------------------------------------- reference
def ref_forward(word_input, last_hidden, params, eps):
    """Pure-JAX mirror of the PyTorch forward (same eps injected)."""
    h0, c0 = last_hidden
    x = params["embedding"][word_input]                  # (B, T, E)
    b, t, _ = x.shape
    n_layers = len(params["lstm"])

    def sigmoid(z):
        return 1.0 / (1.0 + jnp.exp(-z))

    def cell(x_t, h, c, w_ih, w_hh, b_ih, b_hh):
        gates = x_t @ w_ih.T + b_ih + h @ w_hh.T + b_hh
        i_g, f_g, g_g, o_g = jnp.split(gates, 4, axis=-1)
        i_g, f_g, o_g = sigmoid(i_g), sigmoid(f_g), sigmoid(o_g)
        g_g = jnp.tanh(g_g)
        c = f_g * c + i_g * g_g
        h = o_g * jnp.tanh(c)
        return h, c

    hns, cns = [], []
    for layer in range(n_layers):
        w_ih_f, w_hh_f, b_ih_f, b_hh_f = params["lstm"][layer]["fwd"]
        w_ih_r, w_hh_r, b_ih_r, b_hh_r = params["lstm"][layer]["rev"]
        h, c = h0[2 * layer], c0[2 * layer]
        outs_f = []
        for ti in range(t):
            h, c = cell(x[:, ti], h, c, w_ih_f, w_hh_f, b_ih_f, b_hh_f)
            outs_f.append(h)
        hns.append(h); cns.append(c)
        h, c = h0[2 * layer + 1], c0[2 * layer + 1]
        outs_r = [None] * t
        for ti in range(t - 1, -1, -1):
            h, c = cell(x[:, ti], h, c, w_ih_r, w_hh_r, b_ih_r, b_hh_r)
            outs_r[ti] = h
        hns.append(h); cns.append(c)
        x = jnp.stack([jnp.concatenate([outs_f[ti], outs_r[ti]], axis=-1)
                       for ti in range(t)], axis=1)
    mu = jnp.clip(x @ params["mu_est"], -100.0, 100.0)
    logvar = jnp.clip(x @ params["sigma_est"], -10.0, 10.0)
    sampled = mu + eps * jnp.exp(0.5 * logvar)
    return sampled, (jnp.stack(hns), jnp.stack(cns)), mu, logvar


if __name__ == "__main__":
    B, T = 2, 8          # batch, seq_len
    H = 32               # hidden_size
    E = 32               # embedding_size
    V = 50               # vocab size
    NL = 4               # n_layers (bidirectional)

    key = jax.random.PRNGKey(0)
    k_emb, k_ids, k_h, k_c, k_mu, k_sig, k_eps, k_lstm = jax.random.split(key, 8)

    params = {
        "embedding": jax.random.normal(k_emb, (V, E), dtype=jnp.float32) * 0.5,
        "mu_est": jax.random.normal(k_mu, (2 * H, 2 * H), dtype=jnp.float32) * 0.1,
        "sigma_est": jax.random.normal(k_sig, (2 * H, 2 * H), dtype=jnp.float32) * 0.1,
        "lstm": [],
    }
    bound = 1.0 / (H ** 0.5)
    lkeys = jax.random.split(k_lstm, NL * 2 * 4)
    ki = 0
    for layer in range(NL):
        in_dim = E if layer == 0 else 2 * H
        layer_p = {}
        for d in ("fwd", "rev"):
            w_ih = jax.random.uniform(lkeys[ki], (4 * H, in_dim), minval=-bound,
                                      maxval=bound, dtype=jnp.float32); ki += 1
            w_hh = jax.random.uniform(lkeys[ki], (4 * H, H), minval=-bound,
                                      maxval=bound, dtype=jnp.float32); ki += 1
            b_ih = jax.random.uniform(lkeys[ki], (4 * H,), minval=-bound,
                                      maxval=bound, dtype=jnp.float32); ki += 1
            b_hh = jax.random.uniform(lkeys[ki], (4 * H,), minval=-bound,
                                      maxval=bound, dtype=jnp.float32); ki += 1
            layer_p[d] = (w_ih, w_hh, b_ih, b_hh)
        params["lstm"].append(layer_p)

    word_input = jax.random.randint(k_ids, (B, T), 0, V, dtype=jnp.int32)
    h0 = jax.random.normal(k_h, (2 * NL, B, H), dtype=jnp.float32) * 0.1
    c0 = jax.random.normal(k_c, (2 * NL, B, H), dtype=jnp.float32) * 0.1
    eps = jax.random.normal(k_eps, (B, T, 2 * H), dtype=jnp.float32)

    out, (h_n, c_n), mu, logvar = eecoder_gen_lstm_forward(
        word_input, (h0, c0), params, eps)
    out = jax.block_until_ready(out)

    r_out, (r_hn, r_cn), r_mu, r_logvar = ref_forward(
        word_input, (h0, c0), params, eps)

    assert out.shape == (B, T, 2 * H)
    assert h_n.shape == (2 * NL, B, H) and c_n.shape == (2 * NL, B, H)
    for got, ref in ((out, r_out), (h_n, r_hn), (c_n, r_cn),
                     (mu, r_mu), (logvar, r_logvar)):
        assert jnp.allclose(got, ref, atol=5e-3, rtol=5e-3), "mismatch vs reference"

    print("KERNEL_OK")
</pallas_src>

<mosaic_0001>
module attributes {stable_mosaic.version = 11 : i64} {
  func.func @_emb_kernel(%arg0: memref<64x1xi32, #tpu.memory_space<vmem>>, %arg1: memref<128x32xf32, #tpu.memory_space<vmem>>, %arg2: memref<64x32xf32, #tpu.memory_space<vmem>>) attributes {dimension_semantics = [], scalar_prefetch = 0 : i64, scratch_operands = 0 : i64, tpu.core_type = #tpu.core_type<tc>} {
    %c0 = arith.constant 0 : index
    %c0_0 = arith.constant 0 : index
    %0 = vector.load %arg0[%c0, %c0_0] : memref<64x1xi32, #tpu.memory_space<vmem>>, vector<64x1xi32>
    %1 = tpu.iota {dimensions = array<i32: 1>} : vector<64x128xi32>
    %2 = vector.broadcast %0 : vector<64x1xi32> to vector<64x128xi32>
    %3 = arith.cmpi eq, %1, %2 : vector<64x128xi32>
    %4 = arith.extui %3 : vector<64x128xi1> to vector<64x128xi32>
    %5 = arith.sitofp %4 : vector<64x128xi32> to vector<64x128xf32>
    %c0_1 = arith.constant 0 : index
    %c0_2 = arith.constant 0 : index
    %6 = vector.load %arg1[%c0_1, %c0_2] : memref<128x32xf32, #tpu.memory_space<vmem>>, vector<128x32xf32>
    %cst = arith.constant dense<0.000000e+00> : vector<64x32xf32>
    %7 = tpu.matmul %5, %6, %cst {dimension_numbers = #tpu.dot_dimension_numbers<[1], [0], [0], [1], [0, 0, 1, 1], [], []>} : vector<64x128xf32>, vector<128x32xf32>, vector<64x32xf32> -> vector<64x32xf32>
    %c0_3 = arith.constant 0 : index
    %c0_4 = arith.constant 0 : index
    %8 = vector.load %arg2[%c0_3, %c0_4] : memref<64x32xf32, #tpu.memory_space<vmem>>, vector<64x32xf32>
    tpu.vector_store %arg2[%c0_3, %c0_4], %7 {strides = array<i32>} : memref<64x32xf32, #tpu.memory_space<vmem>>, vector<64x32xf32>,
    return
  }
}

</mosaic_0001>

<bundles_post_ra>
// kernel: tpu_custom_call.1
= control target key start
LH: loop header
LB: loop body
LE: loop exit
PB: predicated region body
PF: predicated region fallthrough
CT: control target
= control target key end

     0   :  { %v339_v0 = vmov 0   ;;  %v19_v33 = vlaneseq  ;;  %v340_v37 = vmov 1.0   ;;  %vm190_vm8 = vcmask 261120   ;;  %s460_s0 = inlined_call_operand.vmem [shape: s32[64,1], index: 0, kind: input, shape index: {}]   ;;  %s461_s1 = inlined_call_operand.vmem [shape: f32[128,32], index: 1, kind: input, shape index: {}]   ;;  %s462_s2 = inlined_call_operand.vmem [shape: f32[64,32], index: 2, kind: output, shape index: {}]  }
   0x1   :  { %338 = vset.pattern.permute.xlu1 %v339_v0  ;;  %337 = vset.pattern.permute.xlu0 %v339_v0  ;;  %v12_v1 = vld [vmem:[%s460_s0 + $0x8] sm:$0xff]  ;;  %v11_v2 = vld [vmem:[%s460_s0] sm:$0xff]  ;;  %v71_v7 = vld [vmem:[%s461_s1 + $0x10] sm:$0xff] }
   0x2   :  { %25 = vperm.xlu1 %338, %v12_v1   ;;  %22 = vperm.xlu0 %337, %v11_v2   ;;  %v16_v3 = vld [vmem:[%s460_s0 + $0x28] sm:$0xff]  ;;  %v15_v4 = vld [vmem:[%s460_s0 + $0x20] sm:$0xff]  ;;  %v72_v8 = vld [vmem:[%s461_s1 + $0x18] sm:$0xff]  ;;  %v20_v34 = vand.u32 127, %v19_v33 }
   0x3   :  { %v69_v5 = vld [vmem:[%s461_s1] sm:$0xff]  ;;  %v70_v6 = vld [vmem:[%s461_s1 + $0x8] sm:$0xff]  ;;  %v291_v10 = vpack.c.bf16 %v72_v8, %v71_v7  ;;  %v17_v13 = vld [vmem:[%s460_s0 + $0x30] sm:$0xff] }
   0x4   :  { %v287_v9 = vpack.c.bf16 %v70_v6, %v69_v5  ;;  %v73_v11 = vld [vmem:[%s461_s1 + $0x20] sm:$0xff]  ;;  %v74_v12 = vld [vmem:[%s461_s1 + $0x28] sm:$0xff]  ;;  %v13_v14 = vld [vmem:[%s460_s0 + $0x10] sm:$0xff] }
   0x5   :  { %v295_v15 = vpack.c.bf16 %v74_v12, %v73_v11  ;;  %v75_v16 = vld [vmem:[%s461_s1 + $0x30] sm:$0xff]  ;;  %v76_v17 = vld [vmem:[%s461_s1 + $0x38] sm:$0xff]  ;;  %v77_v21 = vld [vmem:[%s461_s1 + $0x40] sm:$0xff] }
   0x6   :  { %37 = vperm.xlu1 %338, %v16_v3   ;;  %34 = vperm.xlu0 %337, %v15_v4   ;;  %v18_v18 = vld [vmem:[%s460_s0 + $0x38] sm:$0xff]  ;;  %v299_v20 = vpack.c.bf16 %v76_v17, %v75_v16  ;;  %v78_v22 = vld [vmem:[%s461_s1 + $0x48] sm:$0xff]  ;;  %v79_v24 = vld [vmem:[%s461_s1 + $0x50] sm:$0xff] }
   0x7   :  { %288 = vmatprep.subr.bf16.mxu0 %v287_v9  ;;  %319 = vmatprep.subr.bf16.mxu1 %v287_v9  ;;  %v14_v19 = vld [vmem:[%s460_s0 + $0x18] sm:$0xff]  ;;  %v303_v23 = vpack.c.bf16 %v78_v22, %v77_v21  ;;  %v81_v27 = vld [vmem:[%s461_s1 + $0x60] sm:$0xff]  ;;  %v82_v28 = vld [vmem:[%s461_s1 + $0x68] sm:$0xff] }
   0x8   :  { %290 = vmatpush3.bf16.msra.mxu0 %v287_v9  ;;  %327 = vmatpush3.bf16.msra.mxu1 %v287_v9  ;;  %v80_v25 = vld [vmem:[%s461_s1 + $0x58] sm:$0xff]  ;;  %v311_v29 = vpack.c.bf16 %v82_v28, %v81_v27  ;;  %v83_v30 = vld [vmem:[%s461_s1 + $0x70] sm:$0xff] }
   0x9   :  { %292 = vmatprep.subr.bf16.mxu0 %v291_v10  ;;  %320 = vmatprep.subr.bf16.mxu1 %v291_v10  ;;  %v307_v26 = vpack.c.bf16 %v80_v25, %v79_v24  ;;  %v84_v31 = vld [vmem:[%s461_s1 + $0x78] sm:$0xff] }
   0xa   :  { %40 = vperm.xlu1 %338, %v17_v13   ;;  %28 = vperm.xlu0 %337, %v13_v14   ;;  %v315_v32 = vpack.c.bf16 %v84_v31, %v83_v30 }
   0xc   :  { %294 = vmatpush3.bf16.msra.mxu0 %v291_v10  ;;  %328 = vmatpush3.bf16.msra.mxu1 %v291_v10 }
   0xd   :  { %296 = vmatprep.subr.bf16.mxu0 %v295_v15  ;;  %321 = vmatprep.subr.bf16.mxu1 %v295_v15 }
   0xe   :  { %43 = vperm.xlu1 %338, %v18_v18   ;;  %31 = vperm.xlu0 %337, %v14_v19  }
  0x10   :  { %298 = vmatpush3.bf16.msra.mxu0 %v295_v15  ;;  %329 = vmatpush3.bf16.msra.mxu1 %v295_v15 }
  0x11   :  { %300 = vmatprep.subr.bf16.mxu0 %v299_v20  ;;  %322 = vmatprep.subr.bf16.mxu1 %v299_v20 }
  0x14   :  { %302 = vmatpush3.bf16.msra.mxu0 %v299_v20  ;;  %330 = vmatpush3.bf16.msra.mxu1 %v299_v20 }
  0x15   :  { %304 = vmatprep.subr.bf16.mxu0 %v303_v23  ;;  %323 = vmatprep.subr.bf16.mxu1 %v303_v23 }
  0x18   :  { %306 = vmatpush3.bf16.msra.mxu0 %v303_v23  ;;  %331 = vmatpush3.bf16.msra.mxu1 %v303_v23 }
  0x19   :  { %308 = vmatprep.subr.bf16.mxu0 %v307_v26  ;;  %324 = vmatprep.subr.bf16.mxu1 %v307_v26 }
  0x1c   :  { %310 = vmatpush3.bf16.msra.mxu0 %v307_v26  ;;  %332 = vmatpush3.bf16.msra.mxu1 %v307_v26 }
  0x1d   :  { %312 = vmatprep.subr.bf16.mxu0 %v311_v29  ;;  %325 = vmatprep.subr.bf16.mxu1 %v311_v29 }
  0x20   :  { %314 = vmatpush3.bf16.msra.mxu0 %v311_v29  ;;  %333 = vmatpush3.bf16.msra.mxu1 %v311_v29 }
  0x21   :  { %316 = vmatprep.subr.bf16.mxu0 %v315_v32  ;;  %326 = vmatprep.subr.bf16.mxu1 %v315_v32 }
  0x24   :  { %318 = vmatpush3.bf16.msra.mxu0 %v315_v32  ;;  %334 = vmatpush3.bf16.msra.mxu1 %v315_v32 }
  0x81   :  { %v26_v35 = vpop.permute.xlu1 %25  ;;  %v23_v36 = vpop.permute.xlu0 %22 }
  0x82   :  { %vm46_vm0 = vcmp.eq.s32.totalorder %v20_v34, %v26_v35  ;;  %vm45_vm1 = vcmp.eq.s32.totalorder %v20_v34, %v23_v36 }
  0x83   :  { %275 = vmatprep.mubr.msk.f32.mxu0 %vm45_vm1, %v340_v37 }
  0x84   :  { %276 = vmatmul.mubr.msk.f32.vlgmr.msra.gmra.mrb[0].mxu0 %vm46_vm0, %v340_v37 }
  0x85   :  { %v38_v38 = vpop.permute.xlu1 %37  ;;  %v35_v39 = vpop.permute.xlu0 %34 }
  0x86   :  { %vm50_vm2 = vcmp.eq.s32.totalorder %v20_v34, %v38_v38  ;;  %vm49_vm3 = vcmp.eq.s32.totalorder %v20_v34, %v35_v39 }
  0x87   :  { %281 = vmatprep.mubr.msk.f32.mxu1 %vm49_vm3, %v340_v37 }
  0x88   :  { %282 = vmatmul.mubr.msk.f32.vlgmr.msra.gmra.mrb[0].mxu1 %vm50_vm2, %v340_v37 }
  0x89   :  { %v41_v40 = vpop.permute.xlu1 %40  ;;  %v29_v41 = vpop.permute.xlu0 %28 }
  0x8a   :  { %vm51_vm4 = vcmp.eq.s32.totalorder %v20_v34, %v41_v40  ;;  %vm47_vm5 = vcmp.eq.s32.totalorder %v20_v34, %v29_v41 }
  0x8b   :  { %278 = vmatprep.mubr.msk.f32.mxu0 %vm47_vm5, %v340_v37  ;;  %284 = vmatprep.mubr.msk.f32.mxu1 %vm51_vm4, %v340_v37 }
  0x8d   :  { %v44_v42 = vpop.permute.xlu1 %43  ;;  %v32_v43 = vpop.permute.xlu0 %31 }
  0x8e   :  { %vm52_vm6 = vcmp.eq.s32.totalorder %v20_v34, %v44_v42  ;;  %vm48_vm7 = vcmp.eq.s32.totalorder %v20_v34, %v32_v43 }
  0x8f   :  { %279 = vmatmul.mubr.msk.f32.gmra.mrb[2].mxu0 %vm48_vm7, %v340_v37  ;;  %285 = vmatmul.mubr.msk.f32.gmra.mrb[2].mxu1 %vm52_vm6, %v340_v37 }
 0x157   :  { %v277_v44 = vpop.f32.mrb[0].mxu0 }
 0x158   :  { %192 = vst.msk [vmem:[%s462_s2 + $0x8] sm:$0xff] %vm190_vm8, %v277_v44  ;;  %v151_v45 = vpop.f32.mrb[1].mxu0 }
 0x159   :  { %191 = vst.msk [vmem:[%s462_s2] sm:$0xff] %vm190_vm8, %v151_v45 }
 0x15b   :  { %v283_v46 = vpop.f32.mrb[0].mxu1 }
 0x15c   :  { %196 = vst.msk [vmem:[%s462_s2 + $0x28] sm:$0xff] %vm190_vm8, %v283_v46  ;;  %v171_v47 = vpop.f32.mrb[1].mxu1 }
 0x15d   :  { %195 = vst.msk [vmem:[%s462_s2 + $0x20] sm:$0xff] %vm190_vm8, %v171_v47 }
 0x162   :  { %v280_v48 = vpop.f32.mrb[2].mxu0  ;;  %v286_v49 = vpop.f32.mrb[2].mxu1 }
 0x163   :  { %194 = vst.msk [vmem:[%s462_s2 + $0x18] sm:$0xff] %vm190_vm8, %v280_v48  ;;  %198 = vst.msk [vmem:[%s462_s2 + $0x38] sm:$0xff] %vm190_vm8, %v286_v49  ;;  %v161_v50 = vpop.f32.mrb[3].mxu0  ;;  %v181_v51 = vpop.f32.mrb[3].mxu1 }
 0x164   :  { %193 = vst.msk [vmem:[%s462_s2 + $0x10] sm:$0xff] %vm190_vm8, %v161_v50  ;;  %197 = vst.msk [vmem:[%s462_s2 + $0x30] sm:$0xff] %vm190_vm8, %v181_v51 }

</bundles_post_ra>
